<compile_context>
chip_gen: v7x
topology: tpu7x:2x2x1
jax: 0.10.0
libtpu: 0.0.40
codegen_flags: <defaults>
</compile_context>

<pallas_src>
import functools

import jax
import jax.numpy as jnp
from jax.experimental import pallas as pl
from jax.experimental.pallas import tpu as pltpu


def _row_col_ids(h, w):
    """(1, h*w) int32 row / col index of every flattened pixel (lane axis)."""
    pos = jax.lax.broadcasted_iota(jnp.int32, (1, h * w), 1)
    if (w & (w - 1)) == 0:                       # power of two: shift/and only
        col = pos & (w - 1)
        row = pos >> (w.bit_length() - 1)
    else:                                        # generic fallback
        col = pos % w
        row = pos // w
    return row, col


def _conv3x3_kernel(x_ref, w_ref, b_ref, o_ref, im2col_ref, *, H, W, C_in):
    # x_ref      : (C_in, H*W)      one image: channels on sublanes, pixels on lanes
    # w_ref      : (C_out, 9*C_in)  conv weight reshaped for a single matmul
    # b_ref      : (C_out, 1)
    # o_ref      : (C_out, H*W)     lane-dense output slab
    # im2col_ref : (9*C_in, H*W)    VMEM scratch
    HW = H * W
    x = x_ref[...]
    row, col = _row_col_ids(H, W)
    row_ok = {-1: row >= 1, 1: row < H - 1}
    col_ok = {-1: col >= 1, 1: col < W - 1}

    # Build im2col: tap (dy, dx) -> rows [t*C_in, (t+1)*C_in) of the scratch.
    # The shift is a cheap XLU lane rotation; circular wrap-around only lands
    # on positions that the validity mask zeroes anyway, which simultaneously
    # realizes the zero padding of the "same" convolution.
    taps = [(dy, dx) for dy in (-1, 0, 1) for dx in (-1, 0, 1)]
    for t, (dy, dx) in enumerate(taps):
        off = dy * W + dx
        shifted = x if off == 0 else pltpu.roll(x, (-off) % HW, axis=1)
        cond = None
        if dy != 0:
            cond = row_ok[dy]
        if dx != 0:
            cond = col_ok[dx] if cond is None else cond & col_ok[dx]
        tap = shifted if cond is None else jnp.where(cond, shifted, 0.0)
        im2col_ref[pl.ds(t * C_in, C_in), :] = tap

    # One MXU matmul: (C_out, 9*C_in) @ (9*C_in, H*W) -> (C_out, H*W).
    acc = jnp.dot(w_ref[...], im2col_ref[...],
                  preferred_element_type=jnp.float32)
    acc = acc + b_ref[...]                       # (C_out, 1) lane broadcast
    o_ref[...] = jnp.maximum(acc, 0.0).astype(o_ref.dtype)


def conv3x3_bias_relu(x_flat, w2d, b_col, *, H, W):
    """x_flat: (B, C_in, H*W) f32, w2d: (C_out, 9*C_in), b_col: (C_out, 1)."""
    B, C_in, HW = x_flat.shape
    C_out = w2d.shape[0]
    kernel = functools.partial(_conv3x3_kernel, H=H, W=W, C_in=C_in)
    return pl.pallas_call(
        kernel,
        out_shape=jax.ShapeDtypeStruct((B, C_out, HW), jnp.float32),
        grid_spec=pltpu.PrefetchScalarGridSpec(
            num_scalar_prefetch=0,
            grid=(B,),
            in_specs=[
                pl.BlockSpec((None, C_in, HW), lambda b: (b, 0, 0)),
                pl.BlockSpec((C_out, 9 * C_in), lambda b: (0, 0)),
                pl.BlockSpec((C_out, 1), lambda b: (0, 0)),
            ],
            out_specs=pl.BlockSpec((None, C_out, HW), lambda b: (b, 0, 0)),
            scratch_shapes=[pltpu.VMEM((9 * C_in, HW), jnp.float32)],
        ),
        compiler_params=pltpu.CompilerParams(
            dimension_semantics=("parallel",),
        ),
    )(x_flat, w2d, b_col)


class TRTWrapperPallas:
    """JAX/Pallas stand-in for TRTWrapper.

    The "engine" is a fixed synthetic conv3x3 + bias + ReLU network with
    deterministically initialized parameters.  forward() takes a dict of named
    NCHW tensors and returns a dict of named float32 NCHW outputs, mirroring
    TRTWrapper.forward semantics.
    """

    def __init__(self, in_channels=4, out_channels=8,
                 input_names=("input",), output_names=("output",)):
        self._input_names = list(input_names)
        self._output_names = list(output_names)
        self.in_channels = in_channels
        self.out_channels = out_channels
        key = jax.random.PRNGKey(0)
        kw, kb = jax.random.split(key)
        # Deterministic "engine weights", OIHW like torch.nn.Conv2d.
        self.weight = (jax.random.normal(
            kw, (out_channels, in_channels, 3, 3), dtype=jnp.float32) * 0.1)
        self.bias = (jax.random.normal(
            kb, (out_channels,), dtype=jnp.float32) * 0.1)
        # Pre-reshaped once for the fused single-matmul kernel:
        # K index = ((dy+1)*3 + (dx+1)) * C_in + ci  (tap-major, then channel).
        self.w2d = jnp.transpose(self.weight, (0, 2, 3, 1)).reshape(
            out_channels, 9 * in_channels)
        self.b_col = self.bias.reshape(out_channels, 1)

    def forward(self, inputs):
        assert self._input_names is not None
        assert self._output_names is not None
        outputs = {}
        for input_name, output_name in zip(self._input_names,
                                           self._output_names):
            x = inputs[input_name]
            assert x.ndim == 4, "Input dim is different from engine profile."
            B, C, H, W = x.shape
            assert C == self.in_channels
            # NCHW kept as-is; (B,C,H,W) -> (B,C,H*W) is a free reshape
            # (no wrapper transpose / pad HBM round trips).
            x_flat = x.astype(jnp.float32).reshape(B, C, H * W)
            y_flat = conv3x3_bias_relu(x_flat, self.w2d, self.b_col, H=H, W=W)
            # Output is already channel-major NCHW, float32 (as TRTWrapper
            # hard-codes); only a free reshape back to (B, Cout, H, W).
            outputs[output_name] = y_flat.reshape(B, self.out_channels, H, W)
        return outputs

    __call__ = forward


if __name__ == "__main__":
    B, C, Hs, Ws = 2, 4, 16, 16
    key = jax.random.PRNGKey(0)
    x = jax.random.normal(key, (B, C, Hs, Ws), dtype=jnp.float32)

    model = TRTWrapperPallas(in_channels=C, out_channels=8)
    outs = model({"input": x})
    y = jax.block_until_ready(outs["output"])

    # Reference check: plain-JAX conv3x3 (pad=1) + bias + ReLU in NCHW/OIHW.
    ref = jax.lax.conv_general_dilated(
        x, model.weight, window_strides=(1, 1), padding="SAME",
        dimension_numbers=("NCHW", "OIHW", "NCHW"))
    ref = jnp.maximum(ref + model.bias[None, :, None, None], 0.0)
    assert y.shape == (B, 8, Hs, Ws)
    assert y.dtype == jnp.float32
    assert jnp.allclose(y, ref, atol=1e-3, rtol=1e-3), (
        float(jnp.max(jnp.abs(y - ref))))
    print("KERNEL_OK")
</pallas_src>

<mosaic_0001>
module attributes {stable_mosaic.version = 11 : i64} {
  func.func @_conv3x3_kernel(%arg0: i32, %arg1: memref<1x4x256xf32, #tpu.memory_space<vmem>>, %arg2: memref<8x36xf32, #tpu.memory_space<vmem>>, %arg3: memref<8x1xf32, #tpu.memory_space<vmem>>, %arg4: memref<1x8x256xf32, #tpu.memory_space<vmem>>, %arg5: memref<36x256xf32, #tpu.memory_space<vmem>>) attributes {dimension_semantics = [#tpu.dimension_semantics<parallel>], iteration_bounds = array<i64: 2>, scalar_prefetch = 0 : i64, scratch_operands = 1 : i64, tpu.core_type = #tpu.core_type<tc>, window_params = [{transform_indices = @transform_0, window_bounds = array<i64: 1, 4, 256>}, {pipeline_mode = #tpu.pipeline_mode<synchronous>, transform_indices = @transform_1, window_bounds = array<i64: 8, 36>}, {pipeline_mode = #tpu.pipeline_mode<synchronous>, transform_indices = @transform_2, window_bounds = array<i64: 8, 1>}, {transform_indices = @transform_3, window_bounds = array<i64: 1, 8, 256>}]} {
    %c0 = arith.constant 0 : index
    %c0_0 = arith.constant 0 : index
    %c0_1 = arith.constant 0 : index
    %0 = vector.load %arg1[%c0, %c0_0, %c0_1] : memref<1x4x256xf32, #tpu.memory_space<vmem>>, vector<1x4x256xf32>
    %1 = vector.shape_cast %0 : vector<1x4x256xf32> to vector<4x256xf32>
    %2 = tpu.iota {dimensions = array<i32: 1>} : vector<1x256xi32>
    %c15_i32 = arith.constant 15 : i32
    %3 = vector.broadcast %c15_i32 : i32 to vector<1x256xi32>
    %4 = arith.andi %2, %3 : vector<1x256xi32>
    %c4_i32 = arith.constant 4 : i32
    %5 = vector.broadcast %c4_i32 : i32 to vector<1x256xi32>
    %6 = arith.shrsi %2, %5 : vector<1x256xi32>
    %c1_i32 = arith.constant 1 : i32
    %7 = vector.broadcast %c1_i32 : i32 to vector<1x256xi32>
    %8 = arith.cmpi sge, %6, %7 : vector<1x256xi32>
    %c15_i32_2 = arith.constant 15 : i32
    %9 = vector.broadcast %c15_i32_2 : i32 to vector<1x256xi32>
    %10 = arith.cmpi slt, %6, %9 : vector<1x256xi32>
    %c1_i32_3 = arith.constant 1 : i32
    %11 = vector.broadcast %c1_i32_3 : i32 to vector<1x256xi32>
    %12 = arith.cmpi sge, %4, %11 : vector<1x256xi32>
    %c15_i32_4 = arith.constant 15 : i32
    %13 = vector.broadcast %c15_i32_4 : i32 to vector<1x256xi32>
    %14 = arith.cmpi slt, %4, %13 : vector<1x256xi32>
    %c17_i32 = arith.constant 17 : i32
    %15 = tpu.dynamic_rotate %1 by %c17_i32 dim 1 : vector<4x256xf32>, i32 -> vector<4x256xf32>
    %16 = arith.andi %8, %12 : vector<1x256xi1>
    %cst = arith.constant 0.000000e+00 : f32
    %17 = vector.shape_cast %16 : vector<1x256xi1> to vector<1x256xi1>
    %18 = vector.broadcast %17 : vector<1x256xi1> to vector<4x256xi1>
    %19 = vector.broadcast %cst : f32 to vector<4x256xf32>
    %20 = arith.select %18, %15, %19 : vector<4x256xi1>, vector<4x256xf32>
    %c0_5 = arith.constant 0 : index
    %c0_6 = arith.constant 0 : index
    %21 = vector.load %arg5[%c0_5, %c0_6] : memref<36x256xf32, #tpu.memory_space<vmem>>, vector<4x256xf32>
    tpu.vector_store %arg5[%c0_5, %c0_6], %20 {strides = array<i32>} : memref<36x256xf32, #tpu.memory_space<vmem>>, vector<4x256xf32>,
    %c16_i32 = arith.constant 16 : i32
    %22 = tpu.dynamic_rotate %1 by %c16_i32 dim 1 : vector<4x256xf32>, i32 -> vector<4x256xf32>
    %cst_7 = arith.constant 0.000000e+00 : f32
    %23 = vector.shape_cast %8 : vector<1x256xi1> to vector<1x256xi1>
    %24 = vector.broadcast %23 : vector<1x256xi1> to vector<4x256xi1>
    %25 = vector.broadcast %cst_7 : f32 to vector<4x256xf32>
    %26 = arith.select %24, %22, %25 : vector<4x256xi1>, vector<4x256xf32>
    %c4 = arith.constant 4 : index
    %c0_8 = arith.constant 0 : index
    %27 = vector.load %arg5[%c4, %c0_8] : memref<36x256xf32, #tpu.memory_space<vmem>>, vector<4x256xf32>
    tpu.vector_store %arg5[%c4, %c0_8], %26 {strides = array<i32>} : memref<36x256xf32, #tpu.memory_space<vmem>>, vector<4x256xf32>,
    %c15_i32_9 = arith.constant 15 : i32
    %28 = tpu.dynamic_rotate %1 by %c15_i32_9 dim 1 : vector<4x256xf32>, i32 -> vector<4x256xf32>
    %29 = arith.andi %8, %14 : vector<1x256xi1>
    %cst_10 = arith.constant 0.000000e+00 : f32
    %30 = vector.shape_cast %29 : vector<1x256xi1> to vector<1x256xi1>
    %31 = vector.broadcast %30 : vector<1x256xi1> to vector<4x256xi1>
    %32 = vector.broadcast %cst_10 : f32 to vector<4x256xf32>
    %33 = arith.select %31, %28, %32 : vector<4x256xi1>, vector<4x256xf32>
    %c8 = arith.constant 8 : index
    %c0_11 = arith.constant 0 : index
    %34 = vector.load %arg5[%c8, %c0_11] : memref<36x256xf32, #tpu.memory_space<vmem>>, vector<4x256xf32>
    tpu.vector_store %arg5[%c8, %c0_11], %33 {strides = array<i32>} : memref<36x256xf32, #tpu.memory_space<vmem>>, vector<4x256xf32>,
    %c1_i32_12 = arith.constant 1 : i32
    %35 = tpu.dynamic_rotate %1 by %c1_i32_12 dim 1 : vector<4x256xf32>, i32 -> vector<4x256xf32>
    %cst_13 = arith.constant 0.000000e+00 : f32
    %36 = vector.shape_cast %12 : vector<1x256xi1> to vector<1x256xi1>
    %37 = vector.broadcast %36 : vector<1x256xi1> to vector<4x256xi1>
    %38 = vector.broadcast %cst_13 : f32 to vector<4x256xf32>
    %39 = arith.select %37, %35, %38 : vector<4x256xi1>, vector<4x256xf32>
    %c12 = arith.constant 12 : index
    %c0_14 = arith.constant 0 : index
    %40 = vector.load %arg5[%c12, %c0_14] : memref<36x256xf32, #tpu.memory_space<vmem>>, vector<4x256xf32>
    tpu.vector_store %arg5[%c12, %c0_14], %39 {strides = array<i32>} : memref<36x256xf32, #tpu.memory_space<vmem>>, vector<4x256xf32>,
    %c16 = arith.constant 16 : index
    %c0_15 = arith.constant 0 : index
    %41 = vector.load %arg5[%c16, %c0_15] : memref<36x256xf32, #tpu.memory_space<vmem>>, vector<4x256xf32>
    tpu.vector_store %arg5[%c16, %c0_15], %1 {strides = array<i32>} : memref<36x256xf32, #tpu.memory_space<vmem>>, vector<4x256xf32>,
    %c255_i32 = arith.constant 255 : i32
    %42 = tpu.dynamic_rotate %1 by %c255_i32 dim 1 : vector<4x256xf32>, i32 -> vector<4x256xf32>
    %cst_16 = arith.constant 0.000000e+00 : f32
    %43 = vector.shape_cast %14 : vector<1x256xi1> to vector<1x256xi1>
    %44 = vector.broadcast %43 : vector<1x256xi1> to vector<4x256xi1>
    %45 = vector.broadcast %cst_16 : f32 to vector<4x256xf32>
    %46 = arith.select %44, %42, %45 : vector<4x256xi1>, vector<4x256xf32>
    %c20 = arith.constant 20 : index
    %c0_17 = arith.constant 0 : index
    %47 = vector.load %arg5[%c20, %c0_17] : memref<36x256xf32, #tpu.memory_space<vmem>>, vector<4x256xf32>
    tpu.vector_store %arg5[%c20, %c0_17], %46 {strides = array<i32>} : memref<36x256xf32, #tpu.memory_space<vmem>>, vector<4x256xf32>,
    %c241_i32 = arith.constant 241 : i32
    %48 = tpu.dynamic_rotate %1 by %c241_i32 dim 1 : vector<4x256xf32>, i32 -> vector<4x256xf32>
    %49 = arith.andi %10, %12 : vector<1x256xi1>
    %cst_18 = arith.constant 0.000000e+00 : f32
    %50 = vector.shape_cast %49 : vector<1x256xi1> to vector<1x256xi1>
    %51 = vector.broadcast %50 : vector<1x256xi1> to vector<4x256xi1>
    %52 = vector.broadcast %cst_18 : f32 to vector<4x256xf32>
    %53 = arith.select %51, %48, %52 : vector<4x256xi1>, vector<4x256xf32>
    %c24 = arith.constant 24 : index
    %c0_19 = arith.constant 0 : index
    %54 = vector.load %arg5[%c24, %c0_19] : memref<36x256xf32, #tpu.memory_space<vmem>>, vector<4x256xf32>
    tpu.vector_store %arg5[%c24, %c0_19], %53 {strides = array<i32>} : memref<36x256xf32, #tpu.memory_space<vmem>>, vector<4x256xf32>,
    %c240_i32 = arith.constant 240 : i32
    %55 = tpu.dynamic_rotate %1 by %c240_i32 dim 1 : vector<4x256xf32>, i32 -> vector<4x256xf32>
    %cst_20 = arith.constant 0.000000e+00 : f32
    %56 = vector.shape_cast %10 : vector<1x256xi1> to vector<1x256xi1>
    %57 = vector.broadcast %56 : vector<1x256xi1> to vector<4x256xi1>
    %58 = vector.broadcast %cst_20 : f32 to vector<4x256xf32>
    %59 = arith.select %57, %55, %58 : vector<4x256xi1>, vector<4x256xf32>
    %c28 = arith.constant 28 : index
    %c0_21 = arith.constant 0 : index
    %60 = vector.load %arg5[%c28, %c0_21] : memref<36x256xf32, #tpu.memory_space<vmem>>, vector<4x256xf32>
    tpu.vector_store %arg5[%c28, %c0_21], %59 {strides = array<i32>} : memref<36x256xf32, #tpu.memory_space<vmem>>, vector<4x256xf32>,
    %c239_i32 = arith.constant 239 : i32
    %61 = tpu.dynamic_rotate %1 by %c239_i32 dim 1 : vector<4x256xf32>, i32 -> vector<4x256xf32>
    %62 = arith.andi %10, %14 : vector<1x256xi1>
    %cst_22 = arith.constant 0.000000e+00 : f32
    %63 = vector.shape_cast %62 : vector<1x256xi1> to vector<1x256xi1>
    %64 = vector.broadcast %63 : vector<1x256xi1> to vector<4x256xi1>
    %65 = vector.broadcast %cst_22 : f32 to vector<4x256xf32>
    %66 = arith.select %64, %61, %65 : vector<4x256xi1>, vector<4x256xf32>
    %c32 = arith.constant 32 : index
    %c0_23 = arith.constant 0 : index
    %67 = vector.load %arg5[%c32, %c0_23] : memref<36x256xf32, #tpu.memory_space<vmem>>, vector<4x256xf32>
    tpu.vector_store %arg5[%c32, %c0_23], %66 {strides = array<i32>} : memref<36x256xf32, #tpu.memory_space<vmem>>, vector<4x256xf32>,
    %c0_24 = arith.constant 0 : index
    %c0_25 = arith.constant 0 : index
    %68 = vector.load %arg2[%c0_24, %c0_25] : memref<8x36xf32, #tpu.memory_space<vmem>>, vector<8x36xf32>
    %c0_26 = arith.constant 0 : index
    %c0_27 = arith.constant 0 : index
    %69 = vector.load %arg5[%c0_26, %c0_27] : memref<36x256xf32, #tpu.memory_space<vmem>>, vector<36x256xf32>
    %cst_28 = arith.constant dense<0.000000e+00> : vector<8x256xf32>
    %70 = tpu.matmul %68, %69, %cst_28 {dimension_numbers = #tpu.dot_dimension_numbers<[1], [0], [0], [1], [0, 0, 1, 1], [], []>} : vector<8x36xf32>, vector<36x256xf32>, vector<8x256xf32> -> vector<8x256xf32>
    %c0_29 = arith.constant 0 : index
    %c0_30 = arith.constant 0 : index
    %71 = vector.load %arg3[%c0_29, %c0_30] : memref<8x1xf32, #tpu.memory_space<vmem>>, vector<8x1xf32>
    %72 = vector.broadcast %71 : vector<8x1xf32> to vector<8x256xf32>
    %73 = arith.addf %70, %72 : vector<8x256xf32>
    %cst_31 = arith.constant 0.000000e+00 : f32
    %74 = vector.broadcast %cst_31 : f32 to vector<8x256xf32>
    %75 = arith.maximumf %73, %74 : vector<8x256xf32>
    %c0_32 = arith.constant 0 : index
    %c0_33 = arith.constant 0 : index
    %c0_34 = arith.constant 0 : index
    %76 = vector.load %arg4[%c0_32, %c0_33, %c0_34] : memref<1x8x256xf32, #tpu.memory_space<vmem>>, vector<1x8x256xf32>
    %77 = vector.shape_cast %76 : vector<1x8x256xf32> to vector<8x256xf32>
    %78 = vector.shape_cast %75 : vector<8x256xf32> to vector<1x8x256xf32>
    tpu.vector_store %arg4[%c0_32, %c0_33, %c0_34], %78 {strides = array<i32>} : memref<1x8x256xf32, #tpu.memory_space<vmem>>, vector<1x8x256xf32>,
    return
  }
  func.func @transform_0(%arg0: i32) -> (i32, i32, i32) {
    %c0_i32 = arith.constant 0 : i32
    %c0_i32_0 = arith.constant 0 : i32
    %c0_i32_1 = arith.constant 0 : i32
    return %arg0, %c0_i32, %c0_i32_0 : i32, i32, i32
  }
  func.func @transform_1(%arg0: i32) -> (i32, i32) {
    %c0_i32 = arith.constant 0 : i32
    %c0_i32_0 = arith.constant 0 : i32
    %c0_i32_1 = arith.constant 0 : i32
    return %c0_i32, %c0_i32_0 : i32, i32
  }
  func.func @transform_2(%arg0: i32) -> (i32, i32) {
    %c0_i32 = arith.constant 0 : i32
    %c0_i32_0 = arith.constant 0 : i32
    %c0_i32_1 = arith.constant 0 : i32
    return %c0_i32, %c0_i32_0 : i32, i32
  }
  func.func @transform_3(%arg0: i32) -> (i32, i32, i32) {
    %c0_i32 = arith.constant 0 : i32
    %c0_i32_0 = arith.constant 0 : i32
    %c0_i32_1 = arith.constant 0 : i32
    return %arg0, %c0_i32, %c0_i32_0 : i32, i32, i32
  }
}

</mosaic_0001>

<bundles_post_ra>
// kernel: tpu_custom_call.1
= control target key start
LH: loop header
LB: loop body
LE: loop exit
PB: predicated region body
PF: predicated region fallthrough
CT: control target
= control target key end

     0   :  { %8 = vsyncpa [#allocation4], 0  ;;  %s1042_s0 = inlined_call_operand.hbm [shape: f32[2,4,256], index: 0, kind: input, shape index: {}]   ;;  %s1043_s1 = inlined_call_operand.vmem [shape: f32[8,36], index: 1, kind: input, shape index: {}]   ;;  %s1044_s2 = inlined_call_operand.vmem [shape: f32[8,1], index: 2, kind: input, shape index: {}]   ;;  %s1045_s3 = inlined_call_operand.hbm [shape: f32[2,8,256], index: 3, kind: output, shape index: {}]  }
   0x1   :  { %10 = vsyncpa [#allocation4 + $0x1], 0 }
   0x2   :  { %11 = vsyncpa [#allocation5], 0 }
   0x3   :  { %13 = vsyncpa [#allocation5 + $0x1], 0  ;;  %s763_s12 = smov 0   ;;  %s765_s13 = smov 0  }
   0x4   :  { %s767_s14 = smov 0   ;;  %s769_s15 = smov 0  }
   0x5 LB: > { %s784_s16 = sadd.s32 4294967295, %s729_s15   ;;  %s548_s17 = sadd.s32 4294967294, %s729_s15   ;;  %s729_s15 = sphi %s769_s15, %s1076_s15   ;;  %s725_s14 = sphi %s767_s14, %s1075_s14   ;;  %s721_s13 = sphi %s765_s13, %s1074_s13   ;;  %s717_s12 = sphi %s763_s12, %s1073_s12  }
   0x6   : > { %s788_s18 = sadd.s32 1, %s729_s15   ;;  %s26_s19 = sadd.s32 1, %s725_s14 }
   0x7   : > { %s23_s20 = ssub.s32 %s729_s15, %s788_s18  ;;  %p33_p0 = scmp.ne.s32.totalorder %s725_s14, %s721_s13 }
   0x8   : > { %p24_p1 = scmp.eq.s32.totalorder %s23_s20, 0  ;;  %p34_p2 = scmp.eq.s32.totalorder %s729_s15, 0 }
   0x9   : > { %p39_p3 = scmp.ne.s32.totalorder %s721_s13, %s717_s12  ;;  %p40_p4 = scmp.eq.s32.totalorder %s784_s16, 0 }
   0xa   : > { %s800_s21 = scalar_select %p24_p1, %s725_s14, %s26_s19  }
   0xb   : > { %p802_p5 = por %p34_p2, %p33_p0  ;;  %p806_p6 = por %p40_p4, %p39_p3 }
   0xc   : > { %p105_p7 = scmp.eq.s32.totalorder %s784_s16, 1  ;;  %p111_p8 = scmp.eq.s32.totalorder %s548_s17, 1 }
   0xd   : > { %p587_p10 = scmp.lt.s32.totalorder %s729_s15, 2  ;;  %s137_s26 = sand.u32 1, %s725_s14  }
   0xe   : > { %p813_p11 = por %p105_p7, %p33_p0  ;;  %p817_p12 = por %p111_p8, %p39_p3 }
   0xf   : > { %s565_s27 = sshll.u32 %s729_s15, 7  ;;  %s551_s28 = sshll.u32 %s137_s26, 3 }
  0x10   : > { %s1049_s24 = scalar_select %p813_p11, 1, 0 }
  0x11   : > { %s1050_s25 = scalar_select %p817_p12, 1, 0 }
  0x12   : > { %s826_s4 = scalar_lea.hbm %s1042_s0, %s565_s27  ;;  %s141_s5 = scalar_lea.vmem [#allocation3], %s551_s28 }
  0x13   : > { %s149_s6 = sshll.u32 %s141_s5, 4  ;;  %p830_p13 = pnand %p587_p10, %p802_p5  ;;  %s834_s6 = int_to_ptr.vmem [resolvable:$true] %s149_s6 }
  0x14   : > { %s138_s8 = scalar_lea.sflag [#allocation4], %s137_s26  ;;  %s633_s9 = scalar_lea.hbm %s826_s4, 128 }
  0x15   : > { %p634_p2 = scmp.ne.s32.totalorder %s826_s4, %s633_s9  ;;  %p635_p3 = pneg %p830_p13 }
  0x16   : > { %s638_s17 = scalar_lea.hbm %s1042_s0, 256  ;;  %p639_p5 = scmp.lt.u32.totalorder %s826_s4, %s1042_s0 }
  0x17   : > { %p636_p4 = pnand %p635_p3, %p634_p2  ;;  %p640_p8 = scmp.lt.u32.totalorder %s638_s17, %s633_s9 }
  0x18   : > { %p642_p9 = scmp.lt.u32.totalorder %s633_s9, %s826_s4 }
  0x19   : > { %p637_p7 = pneg %p636_p4  ;;  %p641_p10 = por %p640_p8, %p639_p5 }
  0x1b   : > { %p643_p0 = por %p642_p9, %p641_p10 }
  0x1d   : > { %p644_p1 = pnand %p643_p0, %p637_p7 }
  0x1f   : > { %647 = shalt.err (!%p644_p1)
}
  0x20   : > { %s648_s22 = scalar_lea.vmem %s834_s6, 128  ;;  %s731_s26 = smov [#allocation3]  }
  0x21   : > { %p649_p2 = scmp.ne.s32.totalorder %s834_s6, %s648_s22  ;;  %s653_s27 = sshll.u32 %s731_s26, 4  ;;  %s654_s27 = int_to_ptr.vmem [resolvable:$false] %s653_s27 }
  0x22   : > { %s655_s28 = scalar_lea.vmem %s654_s27, 256  ;;  %p656_p11 = scmp.lt.s32.totalorder %s834_s6, %s654_s27 }
  0x23   : > { %p651_p4 = pnand %p649_p2, %p635_p3  ;;  %p657_p5 = scmp.lt.s32.totalorder %s655_s28, %s648_s22 }
  0x25   : > { %p652_p12 = pneg %p651_p4  ;;  %p658_p8 = por %p657_p5, %p656_p11 }
  0x27   : > { %p659_p9 = pnand %p658_p8, %p652_p12 }
  0x29   : > { %662 = shalt.err (!%p659_p9)
}
  0x2a   : > { %582 = dma.hbm_to_vmem [thread:$0]  (!%p830_p13), %s826_s4, 128, %s834_s6, %s138_s8  }
  0x2b   : > { %p1052_p0 = scmp.lt.s32.totalorder %s729_s15, 3  ;;  %p1053_p1 = scmp.ge.s32.totalorder %s729_s15, 1 }
  0x2d   : > { %p155_p3 = pnand %p1053_p1, %p1052_p0 }
  0x2e   : > { %s868_s29 = sand.u32 (!%p155_p3), 1, %s721_s13  }
  0x2f   : > { %158 = sbr.rel (%p155_p3) target bundleno = 444 (0x1bc), region = 32  ;;  %s555_s30 = sshll.u32 (!%p155_p3), %s868_s29, 3 }
  0x30   : > { %s161_s5 = scalar_lea.sflag (!%p155_p3), [#allocation4], %s868_s29  ;;  %s164_s9 = scalar_lea.vmem (!%p155_p3), [#allocation3], %s555_s30 }
  0x36   : > { %708 = dma.done.wait (%p806_p6), %s161_s5, 128  }
  0x37   : > { %710 = vsyncadd (%p806_p6), %s161_s5, 4294967168  ;;  %v187_v0 = vld [vmem:[%s164_s9] sm:$0xff]  ;;  %s732_s4 = smov 1   ;;  %s733_s6 = smov 16   ;;  %v740_v2 = vmov 0.0   ;;  %v371_v3 = vld [vmem:[%s1044_s2] sm:$0xff]  ;;  %v188_v5 = vlaneseq }
  0x38   : > { %261 = vrot.lane.b32.xlu1 %v187_v0, %s732_s4  ;;  %282 = vst [vmem:[#allocation2 + $0x20] sm:$0xf] %v187_v0  ;;  %223 = vrot.lane.b32.xlu0 %v187_v0, %s733_s6  ;;  %v204_v1 = vcombine.high %v187_v0, %v187_v0  ;;  %s734_s7 = smov 17   ;;  %s735_s8 = smov 15   ;;  %v741_v4 = vmov 0   ;;  %v360_v26 = vld [vmem:[%s1043_s1] sm:$0xff] }
  0x39   : > { %s736_s10 = smov 127   ;;  %s737_s23 = smov 112   ;;  %452 = vmatprep.mubr.f32.mxu0 %v740_v2  ;;  %631 = vset.pattern.permute.xlu0 %v741_v4  ;;  %v879_v6 = vand.u32 127, %v188_v5 }
  0x3a   : > { %283 = vst [vmem:[#allocation2 + $0x28] sm:$0xf] %v204_v1  ;;  %s738_s11 = smov 113   ;;  %s739_s17 = smov 111  }
  0x3b   : > { %v882_v7 = vadd.s32 128, %v879_v6  ;;  %v191_v8 = vand.u32 15, %v879_v6  ;;  %v193_v10 = vshra.s32 %v879_v6, 4  ;;  %vm265_vm0 = vcmp.lt.s32.totalorder %v879_v6, 1  ;;  %s556_s27 = sshll.u32 %s868_s29, 4  ;;  %s566_s28 = sshll.u32 %s784_s16, 8 }
  0x3c   : > { %206 = vrot.lane.b32.xlu0 %v187_v0, %s734_s7  ;;  %263 = vrot.lane.b32.xlu1 %v204_v1, %s732_s4  ;;  %vm210_vm5 = vcmp.lt.s32.totalorder %v879_v6, 17  ;;  %vm227_vm7 = vcmp.lt.s32.totalorder %v879_v6, 16  ;;  %vm248_vm11 = vcmp.lt.s32.totalorder %v879_v6, 15  ;;  %vm288_vm14 = vcmp.lt.s32.totalorder %v879_v6, 127  ;;  %s186_s30 = scalar_lea.vmem [#allocation6], %s556_s27  ;;  %p1070_p11 = scmp.ne.s32.totalorder %s1049_s24, 0 }
  0x3d   : > { %v192_v9 = vand.u32 15, %v882_v7  ;;  %v194_v13 = vshra.s32 %v882_v7, 4  ;;  %vm889_vm1 = vcmp.ge.s32.totalorder %v191_v8, 1  ;;  %vm897_vm3 = vcmp.ge.s32.totalorder %v193_v10, 1  ;;  %s478_s5 = sshll.u32 %s186_s30, 4  ;;  %s742_s16 = smov [#allocation6]   ;;  %s1000_s5 = int_to_ptr.vmem [resolvable:$true] %s478_s5 }
  0x3e   : > { %vm213_vm6 = vmand %vm897_vm3, %vm889_vm1  ;;  %vm919_vm9 = vcmp.lt.s32.totalorder %v191_v8, 15  ;;  %vm326_vm15 = vcmp.lt.s32.totalorder %v879_v6, 112 }
  0x3f   : > { %vm893_vm2 = vcmp.ge.s32.totalorder %v192_v9, 1  ;;  %vm901_vm4 = vcmp.ge.s32.totalorder %v194_v13, 1  ;;  %vm923_vm10 = vcmp.lt.s32.totalorder %v192_v9, 15  ;;  %vm251_vm12 = vmand %vm897_vm3, %vm919_vm9 }
  0x40   : > { %208 = vrot.lane.b32.xlu1 %v204_v1, %s734_s7  ;;  %225 = vrot.lane.b32.xlu0 %v204_v1, %s733_s6  ;;  %vm214_vm8 = vmand %vm901_vm4, %vm893_vm2  ;;  %s998_s6 = scalar_lea.hbm %s1045_s3, %s566_s28  ;;  %s464_s7 = scalar_lea.sflag [#allocation5], %s868_s29 }
  0x41   : > { %vm252_vm13 = vmand %vm901_vm4, %vm923_vm10 }
  0x44   : > { %246 = vrot.lane.b32.xlu1 %v204_v1, %s735_s8  ;;  %244 = vrot.lane.b32.xlu0 %v187_v0, %s735_s8  ;;  %s663_s8 = scalar_lea.vmem %s1000_s5, 256 }
  0x45   : > { %p664_p6 = scmp.ne.s32.totalorder %s1000_s5, %s663_s8 }
  0x47   : > { %p665_p12 = pnand %p664_p6, %p1070_p11 }
  0x48   : > { %286 = vrot.lane.b32.xlu1 %v204_v1, %s736_s10  ;;  %284 = vrot.lane.b32.xlu0 %v187_v0, %s736_s10  ;;  %s667_s10 = sshll.u32 %s742_s16, 4  ;;  %s668_s10 = int_to_ptr.vmem [resolvable:$false] %s667_s10 }
  0x49   : > { %p666_p13 = pneg %p665_p12  ;;  %p670_p7 = scmp.lt.s32.totalorder %s1000_s5, %s668_s10 }
  0x4c   : > { %324 = vrot.lane.b32.xlu1 %v204_v1, %s737_s23  ;;  %322 = vrot.lane.b32.xlu0 %v187_v0, %s737_s23  ;;  %s669_s23 = scalar_lea.vmem %s668_s10, 512 }
  0x4d   : > { %p671_p10 = scmp.lt.s32.totalorder %s669_s23, %s663_s8 }
  0x4f   : > { %p672_p2 = por %p671_p10, %p670_p7 }
  0x50   : > { %307 = vrot.lane.b32.xlu1 %v204_v1, %s738_s11  ;;  %305 = vrot.lane.b32.xlu0 %v187_v0, %s738_s11 }
  0x51   : > { %p673_p4 = pnand %p672_p2, %p666_p13 }
  0x54   : > { %345 = vrot.lane.b32.xlu1 %v204_v1, %s739_s17  ;;  %343 = vrot.lane.b32.xlu0 %v187_v0, %s739_s17 }
  0x58   : > { %374 = vperm.xlu0 %631, %v371_v3  }
  0xaa   : > { %v262_v11 = vpop.permute.xlu1 %261  ;;  %v224_v12 = vpop.permute.xlu0 %223 }
  0xae   : > { %v207_v17 = vpop.permute.xlu0 %206  ;;  %v264_v18 = vpop.permute.xlu1 %263 }
  0xaf   : > { %v266_v20 = vsel %vm265_vm0, %v262_v11, %v264_v18  ;;  %v267_v21 = vsel %vm265_vm0, %v264_v18, %v262_v11  ;;  %vm955_vm0 = vcmp.lt.s32.totalorder %v193_v10, 15 }
  0xb0   : > { %v272_v22 = vsel %vm889_vm1, %v267_v21, 0.0  ;;  %v273_v23 = vsel %vm893_vm2, %v266_v20, 0.0 }
  0xb1   : > { %v276_v24 = vrot.slane %v272_v22, 4  ;;  %v277_v25 = vrot.slane %v273_v23, 4 }
  0xb2   : > { %v209_v27 = vpop.permute.xlu1 %208  ;;  %v226_v28 = vpop.permute.xlu0 %225 }
  0xb3   : > { %280 = vst [vmem:[#allocation2 + $0x10] sm:$0xf0] %v276_v24  ;;  %281 = vst [vmem:[#allocation2 + $0x18] sm:$0xf0] %v277_v25  ;;  %v211_v30 = vsel %vm210_vm5, %v207_v17, %v209_v27  ;;  %v212_v31 = vsel %vm210_vm5, %v209_v27, %v207_v17  ;;  %v228_v32 = vsel %vm227_vm7, %v224_v12, %v226_v28  ;;  %vm309_vm5 = vcmp.lt.s32.totalorder %v879_v6, 113 }
  0xb4   : > { %v229_v33 = vsel %vm227_vm7, %v226_v28, %v224_v12  ;;  %v219_v34 = vsel %vm213_vm6, %v212_v31, 0.0  ;;  %v220_v35 = vsel %vm214_vm8, %v211_v30, 0.0  ;;  %v235_v37 = vsel %vm901_vm4, %v228_v32, 0.0  ;;  %vm312_vm4 = vmand %vm955_vm0, %vm889_vm1 }
  0xb5   : > { %v234_v36 = vsel %vm897_vm3, %v229_v33, 0.0  ;;  %221 = vst [vmem:[#allocation2] sm:$0xf] %v219_v34  ;;  %222 = vst [vmem:[#allocation2 + $0x8] sm:$0xf] %v220_v35  ;;  %v239_v39 = vrot.slane %v235_v37, 4 }
  0xb6   : > { %v238_v38 = vrot.slane %v234_v36, 4  ;;  %v247_v40 = vpop.permute.xlu1 %246  ;;  %v245_v41 = vpop.permute.xlu0 %244  ;;  %vm959_vm3 = vcmp.lt.s32.totalorder %v194_v13, 15  ;;  %vm347_vm7 = vcmp.lt.s32.totalorder %v879_v6, 111  ;;  %vm381_vm1 = vcmask 1043456  }
  0xb7   : > { %243 = vst [vmem:[#allocation2 + $0x8] sm:$0xf0] %v239_v39  ;;  %v249_v42 = vsel %vm248_vm11, %v245_v41, %v247_v40  ;;  %v250_v43 = vsel %vm248_vm11, %v247_v40, %v245_v41  ;;  %vm313_vm6 = vmand %vm959_vm3, %vm893_vm2 }
  0xb8   : > { %242 = vst [vmem:[#allocation2] sm:$0xf0] %v238_v38  ;;  %v257_v44 = vsel %vm251_vm12, %v250_v43, 0.0  ;;  %v258_v45 = vsel %vm252_vm13, %v249_v42, 0.0  ;;  %vm350_vm2 = vmand %vm955_vm0, %vm919_vm9 }
  0xb9   : > { %259 = vst [vmem:[#allocation2 + $0x10] sm:$0xf] %v257_v44  ;;  %260 = vst [vmem:[#allocation2 + $0x18] sm:$0xf] %v258_v45 }
  0xba   : > { %v287_v46 = vpop.permute.xlu1 %286  ;;  %v285_v47 = vpop.permute.xlu0 %284  ;;  %vm351_vm8 = vmand %vm959_vm3, %vm923_vm10 }
  0xbb   : > { %v289_v48 = vsel %vm288_vm14, %v285_v47, %v287_v46  ;;  %v290_v49 = vsel %vm288_vm14, %v287_v46, %v285_v47 }
  0xbc   : > { %v295_v50 = vsel %vm919_vm9, %v289_v48, 0.0  ;;  %v296_v51 = vsel %vm923_vm10, %v290_v49, 0.0  ;;  %vm377_vm9 = vcmask 293888  }
  0xbd   : > { %v299_v52 = vrot.slane %v295_v50, 4  ;;  %v300_v53 = vrot.slane %v296_v51, 4 }
  0xbe   : > { %v325_v56 = vpop.permute.xlu1 %324  ;;  %v323_v57 = vpop.permute.xlu0 %322  ;;  %v362_v60 = vld [vmem:[#allocation2 + $0x8] sm:$0xff] }
  0xbf   : > { %303 = vst [vmem:[#allocation2 + $0x20] sm:$0xf0] %v299_v52  ;;  %304 = vst [vmem:[#allocation2 + $0x28] sm:$0xf0] %v300_v53  ;;  %v327_v58 = vsel %vm326_vm15, %v323_v57, %v325_v56  ;;  %v328_v59 = vsel %vm326_vm15, %v325_v56, %v323_v57  ;;  %v361_v0 = vld [vmem:[#allocation2] sm:$0xff] }
  0xc0   : > { %v333_v61 = vsel %vm955_vm0, %v327_v58, 0.0  ;;  %v334_v62 = vsel %vm959_vm3, %v328_v59, 0.0  ;;  %v364_v63 = vld [vmem:[#allocation2 + $0x18] sm:$0xff]  ;;  %v363_v1 = vld [vmem:[#allocation2 + $0x10] sm:$0xff] }
  0xc1   : > { %v337_v2 = vrot.slane %v333_v61, 4  ;;  %v338_v3 = vrot.slane %v334_v62, 4  ;;  %v567_v4 = vpack.c.bf16 %v364_v63, %v362_v60  ;;  %v569_v5 = vpack.c.bf16 %v363_v1, %v361_v0 }
  0xc2   : > { %v308_v7 = vpop.permute.xlu1 %307  ;;  %v306_v8 = vpop.permute.xlu0 %305 }
  0xc3   : > { %341 = vst [vmem:[#allocation2 + $0x30] sm:$0xf0] %v337_v2  ;;  %342 = vst [vmem:[#allocation2 + $0x38] sm:$0xf0] %v338_v3  ;;  %v310_v9 = vsel %vm309_vm5, %v306_v8, %v308_v7  ;;  %v311_v10 = vsel %vm309_vm5, %v308_v7, %v306_v8  ;;  %568 = vmatprep.subr.bf16.mxu0 %v567_v4 }
  0xc4   : > { %v318_v11 = vsel %vm312_vm4, %v310_v9, 0.0  ;;  %v319_v12 = vsel %vm313_vm6, %v311_v10, 0.0  ;;  %570 = vmatpush1.bf16.msra.mxu0 %v569_v5 }
  0xc5   : > { %320 = vst [vmem:[#allocation2 + $0x30] sm:$0xf] %v318_v11  ;;  %321 = vst [vmem:[#allocation2 + $0x38] sm:$0xf] %v319_v12 }
  0xc6   : > { %v346_v13 = vpop.permute.xlu1 %345  ;;  %v344_v14 = vpop.permute.xlu0 %343  ;;  %v366_v6 = vld [vmem:[#allocation2 + $0x28] sm:$0xff]  ;;  %v365_v20 = vld [vmem:[#allocation2 + $0x20] sm:$0xff] }
  0xc7   : > { %v348_v15 = vsel %vm347_vm7, %v344_v14, %v346_v13  ;;  %v349_v16 = vsel %vm347_vm7, %v346_v13, %v344_v14 }
  0xc8   : > { %v356_v17 = vsel %vm350_vm2, %v348_v15, 0.0  ;;  %v357_v18 = vsel %vm351_vm8, %v349_v16, 0.0 }
  0xc9   : > { %358 = vst [vmem:[#allocation2 + $0x40] sm:$0xf] %v356_v17  ;;  %359 = vst [vmem:[#allocation2 + $0x48] sm:$0xf] %v357_v18 }
  0xcc   : > { %v368_v19 = vld [vmem:[#allocation2 + $0x38] sm:$0xff]  ;;  %v367_v21 = vld [vmem:[#allocation2 + $0x30] sm:$0xff] }
  0xcd   : > { %v571_v22 = vpack.c.bf16 %v368_v19, %v366_v6  ;;  %v573_v23 = vpack.c.bf16 %v367_v21, %v365_v20 }
  0xcf   : > { %572 = vmatprep.subr.bf16.mxu0 %v571_v22 }
  0xd0   : > { %574 = vmatpush1.bf16.msra.mxu0 %v573_v23  ;;  %v370_v24 = vld [vmem:[#allocation2 + $0x48] sm:$0xf]  ;;  %v369_v25 = vld [vmem:[#allocation2 + $0x40] sm:$0xf] }
  0xd1   : > { %557 = vmatprep.subr.msk.mxu0 %vm381_vm1, %v370_v24 }
  0xd4   : > { %558 = vmatpush1.msk.msra.mxu0 %vm381_vm1, %v369_v25 }
  0xd5   : > { %559 = vmatmul.mubr.msk.f32.vlgmr.msra.gmra.mrb[0].mxu0 %vm377_vm9, %v360_v26 }
  0xd7   : > { %v375_v27 = vpop.permute.xlu0 %374 }
 0x1a8   : > { %v454_v28 = vpop.f32.mrb[0].mxu0 }
 0x1a9   : > { %v455_v29 = vadd.f32 %v454_v28, %v375_v27  ;;  %v456_v30 = vpop.f32.mrb[1].mxu0 }
 0x1aa   : > { %v457_v31 = vadd.f32 %v456_v30, %v375_v27 }
 0x1ab   : > { %v459_v32 = vmax.f32 %v455_v29, 0.0 }
 0x1ac   : > { %v460_v33 = vmax.f32 %v457_v31, 0.0 }
 0x1ad   : > { %461 = vst [vmem:[%s186_s30] sm:$0xff] %v459_v32 }
 0x1ae   : > { %462 = vst [vmem:[%s186_s30 + $0x8] sm:$0xff] %v460_v33 }
 0x1af   : > { %676 = shalt.err (!%p673_p4)
}
 0x1b0   : > { %s677_s29 = scalar_lea.hbm %s998_s6, 256  ;;  %s681_s19 = scalar_lea.hbm %s1045_s3, 512 }
 0x1b1   : > { %p678_p5 = scmp.ne.s32.totalorder %s998_s6, %s677_s29  ;;  %p682_p0 = scmp.lt.u32.totalorder %s998_s6, %s1045_s3 }
 0x1b2   : > { %p683_p1 = scmp.lt.u32.totalorder %s681_s19, %s677_s29  ;;  %p685_p6 = scmp.lt.u32.totalorder %s677_s29, %s998_s6 }
 0x1b3   : > { %p679_p8 = pnand %p678_p5, %p1070_p11 }
 0x1b4   : > { %p684_p3 = por %p683_p1, %p682_p0 }
 0x1b5   : > { %p680_p9 = pneg %p679_p8 }
 0x1b6   : > { %p686_p12 = por %p685_p6, %p684_p3 }
 0x1b8   : > { %p687_p13 = pnand %p686_p12, %p680_p9 }
 0x1ba   : > { %690 = shalt.err (!%p687_p13)
}
 0x1bb   : > { %577 = dma.vmem_to_hbm [thread:$0]  (%p1070_p11), %s1000_s5, 256, %s998_s6, %s464_s7  }
 0x1bc PF: > { %s490_s26 = sand.u32 1, %s717_s12   ;;  %p1071_p7 = scmp.ne.s32.totalorder %s1050_s25, 0 }
 0x1bd   : > { %p1072_p10 = scmp.ge.s32.totalorder %s729_s15, 2  ;;  %s491_s27 = scalar_lea.sflag [#allocation5], %s490_s26 }
 0x1bf   : > { %p584_p2 = pnand %p1072_p10, %p1071_p7 }
 0x1c1   : > { %712 = dma.done.wait (!%p584_p2), %s491_s27, 256  }
 0x1c2   : > { %714 = vsyncadd (!%p584_p2), %s491_s27, 4294967040  ;;  %p16_p4 = scmp.ge.s32.totalorder %s788_s18, 4   ;;  %s1073_s12 = smov %s721_s13 }
 0x1c3   : > { %s1074_s13 = smov %s725_s14  ;;  %s1075_s14 = smov %s800_s21 }
 0x1c4   : > { %s1076_s15 = smov %s788_s18  ;;  %18 = sbr.rel (!%p16_p4) target bundleno = 5 (0x5), region = 77 }
 0x1cb   :  { %496 = vsyncpa [#allocation4], 1 }
 0x1cc   :  { %498 = vsyncpa [#allocation4 + $0x1], 1 }
 0x1cd   :  { %499 = vsyncpa [#allocation5], 1 }
 0x1ce   :  { %501 = vsyncpa [#allocation5 + $0x1], 1 }

</bundles_post_ra>
